<compile_context>
chip_gen: v7x
topology: tpu7x:2x2x1
jax: 0.10.0
libtpu: 0.0.40
codegen_flags: <defaults>
</compile_context>

<pallas_src>
import functools

import jax
import jax.numpy as jnp
from jax.experimental import pallas as pl
from jax.experimental.pallas import tpu as pltpu


def autopad(k: int) -> int:
    return k // 2


def _round_up(x: int, m: int) -> int:
    return (x + m - 1) // m * m


@functools.lru_cache(maxsize=None)
def _roll_matches_numpy() -> bool:
    """Probe pltpu.roll's shift convention once (outside any jit trace).

    Returns True iff pltpu.roll(x, s, axis)[i] == x[(i - s) % n], i.e. the
    np.roll / jnp.roll convention.  The conv kernel adapts to either sign, so
    the forward pass is correct regardless of the lowering convention.
    """
    def probe(x_ref, o_ref):
        o_ref[...] = pltpu.roll(x_ref[...], 1, axis=1)

    x = jnp.broadcast_to(jax.lax.iota(jnp.float32, 128), (8, 128))
    y = pl.pallas_call(
        probe, out_shape=jax.ShapeDtypeStruct((8, 128), jnp.float32))(x)
    return bool(y[0, 0] == 127.0)


def _default_samples_per_step(batch: int) -> int:
    """v5e/v6e: 1 TensorCore -> collapse the batch into a single grid step.
    v7x: 2 TensorCores -> one sample per step so the 'parallel' grid axis
    spreads the batch across both cores."""
    try:
        kind = jax.devices()[0].device_kind.lower()
    except Exception:
        kind = ""
    if "v7" in kind and batch > 1:
        return 1
    return batch


# ----------------------------------------------------------------------------
# Kernel: fused conv chain (channels-major, lane-dense) + BN partial statistics
# ----------------------------------------------------------------------------
def _fused_convs_stats_kernel(x_ref, *refs, H, W, K, n, roll_np):
    """One block of NB samples, packed along the lane axis.

    x_ref     : (Cin_p, NB*H*W)   channels-major input (zero-padded channels)
    refs[:n]  : conv weight matrices, layer i as (Cout_p_i, K*K*Cin_p_i),
                tap-major column order (kh, kw, cin) matching the patch stack
    refs[n]   : (Cout_p, NB*H*W)  final conv activation (lane dense)
    refs[n+1] : (1, Cout_p, 128)  per-block sum    (lane-broadcast store)
    refs[n+2] : (1, Cout_p, 128)  per-block sum-sq (lane-broadcast store)
    """
    w_refs = refs[:n]
    act_ref = refs[n]
    sum_ref = refs[n + 1]
    sq_ref = refs[n + 2]

    nbhw = x_ref.shape[-1]
    HW = H * W
    p = K // 2

    # Static pixel coordinates of each lane (idx = sample*HW + h*W + w).
    idx = jax.lax.broadcasted_iota(jnp.int32, (1, nbhw), 1)
    hh = (idx % HW) // W
    ww = idx % W

    # Per-tap (lane shift, border mask), computed once and reused by every
    # layer.  Shifts are static; masks are cheap VPU compares on (1, nbhw).
    taps = []
    for kh in range(K):
        dh = kh - p
        for kw in range(K):
            dw = kw - p
            off = dh * W + dw
            if off == 0:
                taps.append((0, None))
                continue
            shift = ((-off) if roll_np else off) % nbhw
            valid = ((hh + dh >= 0) & (hh + dh < H) &
                     (ww + dw >= 0) & (ww + dw < W))
            taps.append((shift, jnp.where(valid, 1.0, 0.0)))

    def conv_layer(act, w_ref):
        # act: (cin_p, nbhw).  Patches (K*K*cin_p, nbhw): stack one slab per
        # tap along the SUBLANE axis; each slab is the activation rolled along
        # the lane axis (XLU) and zeroed outside the image (static mask, VPU).
        slabs = []
        for shift, mask in taps:
            if mask is None:
                slabs.append(act)
            else:
                slabs.append(pltpu.roll(act, shift, axis=1) * mask)
        patches = jnp.concatenate(slabs, axis=0)          # (K*K*cin_p, nbhw)
        # Single lane-dense MXU contraction per layer.
        return jnp.dot(w_ref[...], patches,
                       preferred_element_type=jnp.float32)  # (cout_p, nbhw)

    act = x_ref[...].astype(jnp.float32)
    for i in range(n):
        act = conv_layer(act, w_refs[i])

    act_ref[...] = act

    # Per-block BatchNorm partials; broadcast across 128 lanes so the store is
    # an unmasked full-lane vst (per the perf review).
    cout_p = act.shape[0]
    s = jnp.sum(act, axis=1, keepdims=True)               # (cout_p, 1)
    sq = jnp.sum(act * act, axis=1, keepdims=True)        # (cout_p, 1)
    sum_ref[0] = jnp.broadcast_to(s, (cout_p, 128))
    sq_ref[0] = jnp.broadcast_to(sq, (cout_p, 128))


# ----------------------------------------------------------------------------
# Forward pass (wrapper)
# ----------------------------------------------------------------------------
def my_conv_forward(x_nchw, weights, gamma, beta, eps=1e-5,
                    samples_per_step=None, roll_np=None):
    """weights: list of HWIO tensors (K, K, cin_i, cout_i)."""
    N, Cin, H, W = x_nchw.shape
    n = len(weights)
    K = weights[0].shape[0]
    Cout = weights[-1].shape[-1]
    HW = H * W
    assert K % 2 == 1, "autopad(k)=k//2 gives 'same' output only for odd K"

    if roll_np is None:
        roll_np = _roll_matches_numpy()       # resolve outside jit traces
    if samples_per_step is None:
        samples_per_step = _default_samples_per_step(N)
    NB = samples_per_step
    assert N % NB == 0
    G = N // NB

    cin_p = _round_up(Cin, 8)
    cout_p = _round_up(Cout, 8)

    # Channels-major, lane-packed input (Cin_p, N*HW).  The NCHW -> channels-
    # major move is a tiny boundary transpose; channel rows are zero-padded to
    # a multiple of 8 so every in-kernel value is (8,128)-tile aligned.
    x_cm = jnp.transpose(x_nchw.reshape(N, Cin, HW), (1, 0, 2)).reshape(Cin, N * HW)
    x_cm = jnp.pad(x_cm.astype(jnp.float32), ((0, cin_p - Cin), (0, 0)))

    # Trace-time weight prep: HWIO -> (Cout_p, K*K*Cin_p), tap-major columns,
    # zero-padded channels.  Kept f32 (bf16 would be ~2x MXU on v6e/v7x but
    # risks the 1e-4 tolerance -- see review's correctness concern).
    w_mats = []
    for w in weights:
        ci, co = int(w.shape[2]), int(w.shape[3])
        ci_p, co_p = _round_up(ci, 8), _round_up(co, 8)
        w_p = jnp.zeros((K, K, ci_p, co_p), jnp.float32)
        w_p = w_p.at[:, :, :ci, :co].set(w.astype(jnp.float32))
        w_mats.append(jnp.transpose(w_p.reshape(K * K * ci_p, co_p)))

    kern = functools.partial(_fused_convs_stats_kernel,
                             H=H, W=W, K=K, n=n, roll_np=roll_np)

    in_specs = [pl.BlockSpec((cin_p, NB * HW), lambda b: (0, b))]
    for wm in w_mats:
        in_specs.append(pl.BlockSpec(wm.shape, lambda b: (0, 0)))

    act, sums, sqs = pl.pallas_call(
        kern,
        out_shape=(jax.ShapeDtypeStruct((cout_p, N * HW), jnp.float32),
                   jax.ShapeDtypeStruct((G, cout_p, 128), jnp.float32),
                   jax.ShapeDtypeStruct((G, cout_p, 128), jnp.float32)),
        grid=(G,),
        in_specs=in_specs,
        out_specs=(pl.BlockSpec((cout_p, NB * HW), lambda b: (0, b)),
                   pl.BlockSpec((1, cout_p, 128), lambda b: (b, 0, 0)),
                   pl.BlockSpec((1, cout_p, 128), lambda b: (b, 0, 0))),
        compiler_params=pltpu.CompilerParams(
            dimension_semantics=("parallel",)),
    )(x_cm, *w_mats)

    # Tiny XLA epilogue (fuses; ~16 KiB tensor): fold batch statistics into a
    # single per-channel scale/shift, apply BN + ReLU, channels-major -> NCHW.
    count = N * HW
    mean = jnp.sum(sums[:, :Cout, 0], axis=0) / count
    var = jnp.sum(sqs[:, :Cout, 0], axis=0) / count - mean * mean
    scale = gamma / jnp.sqrt(var + eps)
    shift = beta - mean * scale
    y = jnp.maximum(act[:Cout] * scale[:, None] + shift[:, None], 0.0)
    return jnp.transpose(y.reshape(Cout, N, H, W), (1, 0, 2, 3))


# ----------------------------------------------------------------------------
# The module, in JAX + Pallas
# ----------------------------------------------------------------------------
class MyConvPallas:
    def __init__(self, in_channels, out_channels, kernel_size, n, key,
                 eps=1e-5):
        self.eps = eps
        self.weights = []
        keys = jax.random.split(key, n)
        c_in = in_channels
        for i in range(n):
            c_out = in_channels if (i + 1) != n else out_channels
            # weight stored HWIO: (K, K, Cin, Cout)
            w = 0.1 * jax.random.normal(
                keys[i], (kernel_size, kernel_size, c_in, c_out), jnp.float32)
            self.weights.append(w)
            c_in = c_out
        # BatchNorm2d default affine init (weight=1, bias=0)
        self.gamma = jnp.ones((out_channels,), jnp.float32)
        self.beta = jnp.zeros((out_channels,), jnp.float32)
        # Resolve static kernel configuration outside any jit trace.
        self._roll_np = _roll_matches_numpy()
        # TODO(synk): BatchNorm running_mean/var buffer updates (training-mode
        # side effect) are not implemented; they do not affect forward output.

    def __call__(self, x_nchw):
        return my_conv_forward(x_nchw, self.weights, self.gamma, self.beta,
                               eps=self.eps, roll_np=self._roll_np)


# ----------------------------------------------------------------------------
# Pure-JAX reference for verification
# ----------------------------------------------------------------------------
def _reference(model, x_nchw):
    x = jnp.transpose(x_nchw, (0, 2, 3, 1))
    for w in model.weights:
        k = w.shape[0]
        p = autopad(k)
        x = jax.lax.conv_general_dilated(
            x, w, window_strides=(1, 1), padding=[(p, p), (p, p)],
            dimension_numbers=("NHWC", "HWIO", "NHWC"))
    mean = jnp.mean(x, axis=(0, 1, 2))
    var = jnp.mean((x - mean) ** 2, axis=(0, 1, 2))
    y = (x - mean) / jnp.sqrt(var + model.eps) * model.gamma + model.beta
    y = jnp.maximum(y, 0.0)
    return jnp.transpose(y, (0, 3, 1, 2))


if __name__ == "__main__":
    key = jax.random.PRNGKey(0)
    k_x, k_w = jax.random.split(key)

    # MyConv(in_channels=4, out_channels=8, kernel_size=3, n=2, activation='ReLU')
    N, C_in, H, W = 2, 4, 16, 16
    C_out, K, n_layers = 8, 3, 2

    x = jax.random.normal(k_x, (N, C_in, H, W), jnp.float32)
    model = MyConvPallas(C_in, C_out, K, n_layers, k_w)

    fwd = jax.jit(lambda inp: model(inp))
    out = jax.block_until_ready(fwd(x))

    ref = _reference(model, x)
    assert out.shape == (N, C_out, H, W)
    assert jnp.allclose(out, ref, atol=1e-4, rtol=1e-4), "mismatch vs reference"

    print("KERNEL_OK")
</pallas_src>

<mosaic_0001>
module attributes {stable_mosaic.version = 11 : i64} {
  func.func @probe(%arg0: memref<8x128xf32, #tpu.memory_space<vmem>>, %arg1: memref<8x128xf32, #tpu.memory_space<vmem>>) attributes {dimension_semantics = [], scalar_prefetch = 0 : i64, scratch_operands = 0 : i64, tpu.core_type = #tpu.core_type<tc>} {
    %c0 = arith.constant 0 : index
    %c0_0 = arith.constant 0 : index
    %0 = vector.load %arg0[%c0, %c0_0] : memref<8x128xf32, #tpu.memory_space<vmem>>, vector<8x128xf32>
    %c1_i32 = arith.constant 1 : i32
    %1 = tpu.dynamic_rotate %0 by %c1_i32 dim 1 : vector<8x128xf32>, i32 -> vector<8x128xf32>
    %c0_1 = arith.constant 0 : index
    %c0_2 = arith.constant 0 : index
    %2 = vector.load %arg1[%c0_1, %c0_2] : memref<8x128xf32, #tpu.memory_space<vmem>>, vector<8x128xf32>
    tpu.vector_store %arg1[%c0_1, %c0_2], %1 {strides = array<i32>} : memref<8x128xf32, #tpu.memory_space<vmem>>, vector<8x128xf32>,
    return
  }
}

</mosaic_0001>

<bundles_post_ra>
// kernel: tpu_custom_call.1
= control target key start
LH: loop header
LB: loop body
LE: loop exit
PB: predicated region body
PF: predicated region fallthrough
CT: control target
= control target key end

     0   :  { %6 = vsyncpa [#allocation3], 0  ;;  %s128_s0 = inlined_call_operand.hbm [shape: f32[8,128], index: 0, kind: input, shape index: {}]   ;;  %s129_s1 = inlined_call_operand.hbm [shape: f32[8,128], index: 1, kind: output, shape index: {}]  }
   0x1   :  { %7 = vsyncpa [#allocation4], 0  ;;  %s91_s6 = smov [#allocation2]   ;;  %s43_s10 = scalar_lea.hbm %s128_s0, 128 }
   0x2   :  { %s14_s7 = sshll.u32 %s91_s6, 4  ;;  %p44_p0 = scmp.ne.s32.totalorder %s128_s0, %s43_s10  ;;  %s15_s7 = int_to_ptr.vmem [resolvable:$true] %s14_s7 }
   0x3   :  { %p47_p1 = scmp.lt.u32.totalorder %s43_s10, %s128_s0 }
   0x5   :  { %p49_p2 = pnand %p47_p1, %p44_p0 }
   0x7   :  { %52 = shalt.err (!%p49_p2)
}
   0x8   :  { %s53_s15 = scalar_lea.vmem %s15_s7, 128  ;;  %p58_p4 = scmp.lt.s32.totalorder %s15_s7, %s15_s7 }
   0x9   :  { %p54_p3 = scmp.ne.s32.totalorder %s15_s7, %s53_s15  ;;  %p59_p5 = scmp.lt.s32.totalorder %s53_s15, %s53_s15 }
   0xb   :  { %p60_p6 = por %p59_p5, %p58_p4 }
   0xd   :  { %p61_p7 = pnand %p60_p6, %p54_p3 }
   0xf   :  { %64 = shalt.err (!%p61_p7)
}
  0x10   :  { %17 = dma.hbm_to_vmem [thread:$0]  %s128_s0, 128, %s15_s7, [#allocation3]  }
  0x11   :  { %87 = dma.done.wait [#allocation3], 128  }
  0x12   :  { %88 = vsyncadd [#allocation3], 4294967168  ;;  %v21_v0 = vld [vmem:[#allocation2] sm:$0xff]  ;;  %s92_s18 = smov 1   ;;  %s93_s19 = smov [#allocation5]  }
  0x13   :  { %22 = vrot.lane.b32.xlu0 %v21_v0, %s92_s18  ;;  %s31_s20 = sshll.u32 %s93_s19, 4  ;;  %s32_s20 = int_to_ptr.vmem [resolvable:$true] %s31_s20 }
  0x14   :  { %s65_s21 = scalar_lea.vmem %s32_s20, 128  ;;  %p70_p9 = scmp.lt.s32.totalorder %s32_s20, %s32_s20 }
  0x15   :  { %p66_p8 = scmp.ne.s32.totalorder %s32_s20, %s65_s21  ;;  %p71_p10 = scmp.lt.s32.totalorder %s65_s21, %s65_s21 }
  0x17   :  { %p72_p11 = por %p71_p10, %p70_p9 }
  0x19   :  { %p73_p12 = pnand %p72_p11, %p66_p8 }
  0x85   :  { %v23_v1 = vpop.permute.xlu0 %22 }
  0x86   :  { %24 = vst [vmem:[#allocation5] sm:$0xff] %v23_v1 }
  0x87   :  { %76 = shalt.err (!%p73_p12)
}
  0x88   :  { %s77_s0 = scalar_lea.hbm %s129_s1, 128 }
  0x89   :  { %p78_p13 = scmp.ne.s32.totalorder %s129_s1, %s77_s0  ;;  %p81_p0 = scmp.lt.u32.totalorder %s77_s0, %s129_s1 }
  0x8b   :  { %p83_p1 = pnand %p81_p0, %p78_p13 }
  0x8d   :  { %86 = shalt.err (!%p83_p1)
}
  0x8e   :  { %34 = dma.vmem_to_hbm [thread:$0]  %s32_s20, 128, %s129_s1, [#allocation4]  }
  0x8f   :  { %89 = dma.done.wait [#allocation4], 128  }
  0x90   :  { %90 = vsyncadd [#allocation4], 4294967168 }
  0x91   :  { %38 = vsyncpa [#allocation3], 1 }
  0x92   :  { %39 = vsyncpa [#allocation4], 1 }

</bundles_post_ra>
